<compile_context>
chip_gen: v6e
topology: v6e:2x2x1
jax: 0.10.0
libtpu: 0.0.40
codegen_flags: <defaults>
</compile_context>

<pallas_src>
import jax
import jax.numpy as jnp
import numpy as np
from jax.experimental import pallas as pl
from jax.experimental.pallas import tpu as pltpu

# ---- problem sizes (small, consistent with the module) ----
N, C, H, W = 2, 4, 16, 16
STRIDE = 2
OH, OW = H // STRIDE, W // STRIDE
NOW = N * OH * OW            # 128 -> exactly fills the 128-lane axis
PAD = 2                      # global padding = max conv padding (5x5 conv)
K5 = 5                       # unified 5x5 tap grid; all branches are subsets
NTAP = K5 * K5               # 25
# 2x2 / stride-2 pool taps inside the 5x5 tap grid: (dy,dx) in {2,3}x{2,3}
POOL_TAPS = (12, 13, 17, 18)


def mixed_op_kernel(wmix_ref,      # SMEM (scalar prefetch): (6,) mixture weights
                    patch_ref,     # VMEM: (25*C, N*OH*OW) im2col patch slab
                    wbasis_ref,    # VMEM: (5, C, 25*C) per-branch weight blocks
                    o_ref):        # VMEM: (C, N*OH*OW) lane-dense output
    # wmix-combined weight of every linear branch:
    #   conv1x1 / conv3x3 / conv5x5 / depthwise3x3 / avg_pool (linear -> folded)
    # Tiny VPU work: 5 broadcast-muls + 4 adds on a (C, 25*C)=(4,100) block.
    wc = (wmix_ref[0] * wbasis_ref[0]
          + wmix_ref[1] * wbasis_ref[1]
          + wmix_ref[2] * wbasis_ref[2]
          + wmix_ref[3] * wbasis_ref[3]
          + wmix_ref[5] * wbasis_ref[4])                         # (C, 25*C)

    # One MXU dot replaces the 35 tiny per-tap matmuls + depthwise/avg adds.
    # (bf16 operand cast only pays off at larger C; keep f32 at this size.)
    lin = jnp.dot(wc, patch_ref[...],
                  preferred_element_type=jnp.float32)            # (C, NOW)

    # max-pool 2x2 stride 2 on lane-dense (C, 128) views (only nonlinear branch)
    def tap(t):                                                  # (C, NOW)
        return patch_ref[t * C:(t + 1) * C, :]
    mx = jnp.maximum(jnp.maximum(tap(POOL_TAPS[0]), tap(POOL_TAPS[1])),
                     jnp.maximum(tap(POOL_TAPS[2]), tap(POOL_TAPS[3])))

    o_ref[...] = lin + wmix_ref[4] * mx


def mixed_op(x, wmix, w1, w3, w5, wd):
    """x: (N, C, H, W) f32 NCHW.  wmix: (6,).  Conv weights in PyTorch OIHW."""
    # --- glue (pure layout, XLA): zero-pad + im2col over the unified 5x5 taps ---
    xp = jnp.pad(x, ((0, 0), (0, 0), (PAD, PAD), (PAD, PAD)))
    taps = [xp[:, :, dy:dy + STRIDE * OH:STRIDE, dx:dx + STRIDE * OW:STRIDE]
            for dy in range(K5) for dx in range(K5)]             # (N,C,OH,OW) each
    patches = jnp.stack(taps, axis=0)                            # (25, N, C, OH, OW)
    patches = jnp.transpose(patches, (0, 2, 1, 3, 4))            # (25, C, N, OH, OW)
    patches = patches.reshape(NTAP * C, NOW)                     # (100, 128)

    # --- glue: per-branch weights as (C, 25*C) blocks over the same tap grid ---
    def conv_big(w_oihw, pad):
        wp = jnp.pad(w_oihw, ((0, 0), (0, 0), (pad, pad), (pad, pad)))  # (C,C,5,5)
        return jnp.transpose(wp, (0, 2, 3, 1)).reshape(C, NTAP * C)

    eye = jnp.eye(C, dtype=jnp.float32)
    wd_pad = jnp.pad(wd[:, 0], ((0, 0), (1, 1), (1, 1)))                # (C,5,5)
    wd_big = (wd_pad[:, :, :, None] * eye[:, None, None, :]).reshape(C, NTAP * C)
    avg_mask = jnp.zeros((K5, K5), jnp.float32).at[2:4, 2:4].set(0.25)
    avg_big = (avg_mask[None, :, :, None] * eye[:, None, None, :]).reshape(C, NTAP * C)
    w_basis = jnp.stack([conv_big(w1, 2), conv_big(w3, 1), conv_big(w5, 0),
                         wd_big, avg_big], axis=0)               # (5, C, 100)

    grid_spec = pltpu.PrefetchScalarGridSpec(
        num_scalar_prefetch=1,        # wmix -> SMEM
        grid=(1,),                    # collapsed grid: one step, no pipeline churn
        in_specs=[
            pl.BlockSpec((NTAP * C, NOW), lambda i, wm: (0, 0)),
            pl.BlockSpec((5, C, NTAP * C), lambda i, wm: (0, 0, 0)),
        ],
        out_specs=pl.BlockSpec((C, NOW), lambda i, wm: (0, 0)),
    )

    out = pl.pallas_call(
        mixed_op_kernel,
        out_shape=jax.ShapeDtypeStruct((C, NOW), jnp.float32),
        grid_spec=grid_spec,
        compiler_params=pltpu.CompilerParams(
            dimension_semantics=("arbitrary",)),
    )(wmix, patches, w_basis)

    # lane-dense (C, N*OH*OW) -> NCHW
    return jnp.transpose(out.reshape(C, N, OH, OW), (1, 0, 2, 3))


def reference(x, wmix, w1, w3, w5, wd):
    dn = ('NCHW', 'OIHW', 'NCHW')
    hi = jax.lax.Precision.HIGHEST
    conv = lambda w, p, g=1: jax.lax.conv_general_dilated(
        x, w, (STRIDE, STRIDE), [(p, p), (p, p)], dimension_numbers=dn,
        feature_group_count=g, precision=hi)
    c1, c3, c5 = conv(w1, 0), conv(w3, 1), conv(w5, 2)
    dw = conv(wd, 1, C)
    mx = jax.lax.reduce_window(x, -jnp.inf, jax.lax.max,
                               (1, 1, 2, 2), (1, 1, 2, 2), 'VALID')
    av = jax.lax.reduce_window(x, 0.0, jax.lax.add,
                               (1, 1, 2, 2), (1, 1, 2, 2), 'VALID') / 4.0
    return (wmix[0] * c1 + wmix[1] * c3 + wmix[2] * c5
            + wmix[3] * dw + wmix[4] * mx + wmix[5] * av)


if __name__ == "__main__":
    key = jax.random.PRNGKey(0)
    kx, k1, k3, k5, kd, kw = jax.random.split(key, 6)
    x = jax.random.normal(kx, (N, C, H, W), jnp.float32)
    w1 = 0.1 * jax.random.normal(k1, (C, C, 1, 1), jnp.float32)
    w3 = 0.1 * jax.random.normal(k3, (C, C, 3, 3), jnp.float32)
    w5 = 0.1 * jax.random.normal(k5, (C, C, 5, 5), jnp.float32)
    wd = 0.1 * jax.random.normal(kd, (C, 1, 3, 3), jnp.float32)
    wmix = jax.nn.softmax(jax.random.normal(kw, (6,), jnp.float32))

    out = jax.block_until_ready(mixed_op(x, wmix, w1, w3, w5, wd))
    ref = jax.block_until_ready(reference(x, wmix, w1, w3, w5, wd))

    err = float(jnp.max(jnp.abs(out - ref)))
    if not np.allclose(np.asarray(out), np.asarray(ref), atol=3e-2, rtol=3e-2):
        raise AssertionError(f"mismatch vs reference, max abs err = {err}")
    print("KERNEL_OK")
</pallas_src>

<mosaic_0001>
module attributes {stable_mosaic.version = 11 : i64} {
  func.func @mixed_op_kernel(%arg0: i32, %arg1: memref<6xf32, #tpu.memory_space<smem>>, %arg2: memref<100x128xf32, #tpu.memory_space<vmem>>, %arg3: memref<5x4x100xf32, #tpu.memory_space<vmem>>, %arg4: memref<4x128xf32, #tpu.memory_space<vmem>>) attributes {dimension_semantics = [#tpu.dimension_semantics<arbitrary>], iteration_bounds = array<i64: 1>, scalar_prefetch = 1 : i64, scratch_operands = 0 : i64, tpu.core_type = #tpu.core_type<tc>, window_params = [{pipeline_mode = #tpu.pipeline_mode<synchronous>, transform_indices = @transform_0, window_bounds = array<i64: 100, 128>}, {pipeline_mode = #tpu.pipeline_mode<synchronous>, transform_indices = @transform_1, window_bounds = array<i64: 5, 4, 100>}, {pipeline_mode = #tpu.pipeline_mode<synchronous>, transform_indices = @transform_2, window_bounds = array<i64: 4, 128>}]} {
    %c0 = arith.constant 0 : index
    %0 = memref.load %arg1[%c0] : memref<6xf32, #tpu.memory_space<smem>>
    %c0_0 = arith.constant 0 : index
    %c0_1 = arith.constant 0 : index
    %c0_2 = arith.constant 0 : index
    %1 = vector.load %arg3[%c0_0, %c0_1, %c0_2] : memref<5x4x100xf32, #tpu.memory_space<vmem>>, vector<1x4x100xf32>
    %2 = vector.shape_cast %1 : vector<1x4x100xf32> to vector<4x100xf32>
    %3 = vector.broadcast %0 : f32 to vector<4x100xf32>
    %4 = arith.mulf %3, %2 : vector<4x100xf32>
    %c1 = arith.constant 1 : index
    %5 = memref.load %arg1[%c1] : memref<6xf32, #tpu.memory_space<smem>>
    %c1_3 = arith.constant 1 : index
    %c0_4 = arith.constant 0 : index
    %c0_5 = arith.constant 0 : index
    %6 = vector.load %arg3[%c1_3, %c0_4, %c0_5] : memref<5x4x100xf32, #tpu.memory_space<vmem>>, vector<1x4x100xf32>
    %7 = vector.shape_cast %6 : vector<1x4x100xf32> to vector<4x100xf32>
    %8 = vector.broadcast %5 : f32 to vector<4x100xf32>
    %9 = arith.mulf %8, %7 : vector<4x100xf32>
    %10 = arith.addf %4, %9 : vector<4x100xf32>
    %c2 = arith.constant 2 : index
    %11 = memref.load %arg1[%c2] : memref<6xf32, #tpu.memory_space<smem>>
    %c2_6 = arith.constant 2 : index
    %c0_7 = arith.constant 0 : index
    %c0_8 = arith.constant 0 : index
    %12 = vector.load %arg3[%c2_6, %c0_7, %c0_8] : memref<5x4x100xf32, #tpu.memory_space<vmem>>, vector<1x4x100xf32>
    %13 = vector.shape_cast %12 : vector<1x4x100xf32> to vector<4x100xf32>
    %14 = vector.broadcast %11 : f32 to vector<4x100xf32>
    %15 = arith.mulf %14, %13 : vector<4x100xf32>
    %16 = arith.addf %10, %15 : vector<4x100xf32>
    %c3 = arith.constant 3 : index
    %17 = memref.load %arg1[%c3] : memref<6xf32, #tpu.memory_space<smem>>
    %c3_9 = arith.constant 3 : index
    %c0_10 = arith.constant 0 : index
    %c0_11 = arith.constant 0 : index
    %18 = vector.load %arg3[%c3_9, %c0_10, %c0_11] : memref<5x4x100xf32, #tpu.memory_space<vmem>>, vector<1x4x100xf32>
    %19 = vector.shape_cast %18 : vector<1x4x100xf32> to vector<4x100xf32>
    %20 = vector.broadcast %17 : f32 to vector<4x100xf32>
    %21 = arith.mulf %20, %19 : vector<4x100xf32>
    %22 = arith.addf %16, %21 : vector<4x100xf32>
    %c5 = arith.constant 5 : index
    %23 = memref.load %arg1[%c5] : memref<6xf32, #tpu.memory_space<smem>>
    %c4 = arith.constant 4 : index
    %c0_12 = arith.constant 0 : index
    %c0_13 = arith.constant 0 : index
    %24 = vector.load %arg3[%c4, %c0_12, %c0_13] : memref<5x4x100xf32, #tpu.memory_space<vmem>>, vector<1x4x100xf32>
    %25 = vector.shape_cast %24 : vector<1x4x100xf32> to vector<4x100xf32>
    %26 = vector.broadcast %23 : f32 to vector<4x100xf32>
    %27 = arith.mulf %26, %25 : vector<4x100xf32>
    %28 = arith.addf %22, %27 : vector<4x100xf32>
    %c0_14 = arith.constant 0 : index
    %c0_15 = arith.constant 0 : index
    %29 = vector.load %arg2[%c0_14, %c0_15] : memref<100x128xf32, #tpu.memory_space<vmem>>, vector<100x128xf32>
    %cst = arith.constant dense<0.000000e+00> : vector<4x128xf32>
    %30 = tpu.matmul %28, %29, %cst {dimension_numbers = #tpu.dot_dimension_numbers<[1], [0], [0], [1], [0, 0, 1, 1], [], []>} : vector<4x100xf32>, vector<100x128xf32>, vector<4x128xf32> -> vector<4x128xf32>
    %c48 = arith.constant 48 : index
    %c0_16 = arith.constant 0 : index
    %31 = vector.load %arg2[%c48, %c0_16] : memref<100x128xf32, #tpu.memory_space<vmem>>, vector<4x128xf32>
    %c52 = arith.constant 52 : index
    %c0_17 = arith.constant 0 : index
    %32 = vector.load %arg2[%c52, %c0_17] : memref<100x128xf32, #tpu.memory_space<vmem>>, vector<4x128xf32>
    %33 = arith.maximumf %31, %32 : vector<4x128xf32>
    %c68 = arith.constant 68 : index
    %c0_18 = arith.constant 0 : index
    %34 = vector.load %arg2[%c68, %c0_18] : memref<100x128xf32, #tpu.memory_space<vmem>>, vector<4x128xf32>
    %c72 = arith.constant 72 : index
    %c0_19 = arith.constant 0 : index
    %35 = vector.load %arg2[%c72, %c0_19] : memref<100x128xf32, #tpu.memory_space<vmem>>, vector<4x128xf32>
    %36 = arith.maximumf %34, %35 : vector<4x128xf32>
    %37 = arith.maximumf %33, %36 : vector<4x128xf32>
    %c4_20 = arith.constant 4 : index
    %38 = memref.load %arg1[%c4_20] : memref<6xf32, #tpu.memory_space<smem>>
    %39 = vector.broadcast %38 : f32 to vector<4x128xf32>
    %40 = arith.mulf %39, %37 : vector<4x128xf32>
    %41 = arith.addf %30, %40 : vector<4x128xf32>
    %c0_21 = arith.constant 0 : index
    %c0_22 = arith.constant 0 : index
    %42 = vector.load %arg4[%c0_21, %c0_22] : memref<4x128xf32, #tpu.memory_space<vmem>>, vector<4x128xf32>
    tpu.vector_store %arg4[%c0_21, %c0_22], %41 {strides = array<i32>} : memref<4x128xf32, #tpu.memory_space<vmem>>, vector<4x128xf32>,
    return
  }
  func.func @transform_0(%arg0: i32, %arg1: memref<6xf32, #tpu.memory_space<smem>>) -> (i32, i32) {
    %c0_i32 = arith.constant 0 : i32
    %c0_i32_0 = arith.constant 0 : i32
    %c0_i32_1 = arith.constant 0 : i32
    return %c0_i32, %c0_i32_0 : i32, i32
  }
  func.func @transform_1(%arg0: i32, %arg1: memref<6xf32, #tpu.memory_space<smem>>) -> (i32, i32, i32) {
    %c0_i32 = arith.constant 0 : i32
    %c0_i32_0 = arith.constant 0 : i32
    %c0_i32_1 = arith.constant 0 : i32
    %c0_i32_2 = arith.constant 0 : i32
    return %c0_i32, %c0_i32_0, %c0_i32_1 : i32, i32, i32
  }
  func.func @transform_2(%arg0: i32, %arg1: memref<6xf32, #tpu.memory_space<smem>>) -> (i32, i32) {
    %c0_i32 = arith.constant 0 : i32
    %c0_i32_0 = arith.constant 0 : i32
    %c0_i32_1 = arith.constant 0 : i32
    return %c0_i32, %c0_i32_0 : i32, i32
  }
}

</mosaic_0001>

<bundles_post_ra>
// kernel: tpu_custom_call.1
= control target key start
LH: loop header
LB: loop body
LE: loop exit
PB: predicated region body
PF: predicated region fallthrough
CT: control target
= control target key end

     0   :  { %s327_s12 = smov [#allocation3]   ;;  %s383_s0 = inlined_call_operand.hbm [shape: f32[6], index: 0, kind: input, shape index: {}]   ;;  %s384_s1 = inlined_call_operand.hbm [shape: f32[100,128], index: 1, kind: input, shape index: {}]   ;;  %s385_s2 = inlined_call_operand.hbm [shape: f32[5,4,100], index: 2, kind: input, shape index: {}]   ;;  %s386_s3 = inlined_call_operand.hbm [shape: f32[4,128], index: 3, kind: output, shape index: {}]  }
   0x1   :  { %9 = dma.hbm_to_smem %s383_s0, 16, %s327_s12, [#allocation2] }
   0x2   :  { %319 = dma.done.wait [#allocation2], 16 }
   0x3   :  { %320 = vsyncadd [#allocation2], 4294967280 }
   0x4   :  { %11 = sfence }
   0x5   :  { %12 = vsyncpa [#allocation5], 0 }
   0x6   :  { %13 = vsyncpa [#allocation8], 0 }
   0x7   :  { %14 = vsyncpa [#allocation6], 0  ;;  %s328_s15 = smov [#allocation4]  }
   0x8   :  { %s20_s16 = sshll.u32 %s328_s15, 4  ;;  %s21_s16 = int_to_ptr.vmem [resolvable:$true] %s20_s16 }
   0x9   :  { %s267_s17 = scalar_lea.vmem %s21_s16, 1664  ;;  %p272_p1 = scmp.lt.s32.totalorder %s21_s16, %s21_s16 }
   0xa   :  { %p268_p0 = scmp.ne.s32.totalorder %s21_s16, %s267_s17  ;;  %p273_p2 = scmp.lt.s32.totalorder %s267_s17, %s267_s17 }
   0xc   :  { %p274_p3 = por %p273_p2, %p272_p1 }
   0xe   :  { %p275_p4 = pnand %p274_p3, %p268_p0 }
  0x10   :  { %278 = shalt.err (!%p275_p4)
}
  0x11   :  { %s329_s18 = smov 128   ;;  %s330_s19 = smov 8  }
  0x12   :  { %26 = dma.hbm_to_vmem [thread:$0]  %s384_s1, 1664, %s21_s16, [#allocation5], %s329_s18, %s329_s18, %s330_s19  }
  0x13   :  { %s331_s21 = smov [#allocation7]  }
  0x14   :  { %s32_s22 = sshll.u32 %s331_s21, 4  ;;  %s33_s22 = int_to_ptr.vmem [resolvable:$true] %s32_s22 }
  0x15   :  { %s287_s23 = scalar_lea.vmem %s33_s22, 320  ;;  %p292_p6 = scmp.lt.s32.totalorder %s33_s22, %s33_s22 }
  0x16   :  { %p288_p5 = scmp.ne.s32.totalorder %s33_s22, %s287_s23  ;;  %p293_p7 = scmp.lt.s32.totalorder %s287_s23, %s287_s23 }
  0x18   :  { %p294_p8 = por %p293_p7, %p292_p6 }
  0x1a   :  { %p295_p9 = pnand %p294_p8, %p288_p5 }
  0x1c   :  { %298 = shalt.err (!%p295_p9)
}
  0x1d   :  { %s332_s24 = smov 64   ;;  %s333_s25 = smov 4  }
  0x1e   :  { %38 = dma.hbm_to_vmem [thread:$0]  %s385_s2, 320, %s33_s22, [#allocation8], %s332_s24, %s332_s24, %s333_s25  }
  0x1f   :  { %321 = dma.done.wait [#allocation5], 1664  }
  0x20   :  { %322 = vsyncadd [#allocation5], 4294965632 }
  0x21   :  { %323 = dma.done.wait [#allocation8], 320  }
  0x22   :  { %324 = vsyncadd [#allocation8], 4294966976  ;;  %v334_v0 = vmov 0.0   ;;  %vm335_vm0 = vmmov 0   ;;  %s45_s1 = sld [smem:[#allocation3]]  ;;  %vm100_vm1 = vcmask 1043456  }
  0x23   :  { %212 = vmatprep.subr.mxu0 %v334_v0  ;;  %238 = vmatprep.mubr.msk.f32.mxu0 %vm335_vm0, %v334_v0  ;;  %s191_s28 = sld [smem:[#allocation3 + $0x1]]  ;;  %v85_v1 = vld [vmem:[#allocation4 + $0x60] sm:$0xf]  ;;  %v84_v2 = vld [vmem:[#allocation4 + $0x58] sm:$0xff]  ;;  %v83_v3 = vld [vmem:[#allocation4 + $0x50] sm:$0xff]  ;;  %vm96_vm2 = vcmask 818176  }
  0x24   :  { %s192_s29 = sld [smem:[#allocation3 + $0x2]]  ;;  %213 = vmatpush3.msk.msra.mxu0 %vm100_vm1, %v85_v1  ;;  %v82_v6 = vld [vmem:[#allocation4 + $0x48] sm:$0xff]  ;;  %v81_v9 = vld [vmem:[#allocation4 + $0x40] sm:$0xff]  ;;  %v57_v12 = vld [vmem:[#allocation7 + $0x8] sm:$0xf]  ;;  %s336_s5 = smov [#allocation9]  }
  0x25   :  { %214 = vmatprep.subr.mxu0 %v334_v0  ;;  %s193_s2 = sld [smem:[#allocation3 + $0x3]]  ;;  %v46_v7 = vld [vmem:[#allocation7] sm:$0xf]  ;;  %v51_v8 = vld [vmem:[#allocation7 + $0x4] sm:$0xf]  ;;  %v80_v14 = vld [vmem:[#allocation4 + $0x38] sm:$0xff] }
  0x26   :  { %215 = vmatpush3.msra.mxu0 %v84_v2  ;;  %s194_s30 = sld [smem:[#allocation3 + $0x5]]  ;;  %v79_v15 = vld [vmem:[#allocation4 + $0x30] sm:$0xff]  ;;  %v78_v20 = vld [vmem:[#allocation4 + $0x28] sm:$0xff]  ;;  %v77_v21 = vld [vmem:[#allocation4 + $0x20] sm:$0xff]  ;;  %s181_s6 = sshll.u32 %s336_s5, 4  ;;  %s182_s6 = int_to_ptr.vmem [resolvable:$true] %s181_s6 }
  0x27   :  { %216 = vmatprep.subr.mxu0 %v334_v0  ;;  %v63_v18 = vld [vmem:[#allocation7 + $0xc] sm:$0xf]  ;;  %v69_v24 = vld [vmem:[#allocation7 + $0x10] sm:$0xf]  ;;  %v74_v30 = vld [vmem:[#allocation4 + $0x8] sm:$0xff]  ;;  %s195_s4 = sld [smem:[#allocation3 + $0x4]]  ;;  %p304_p11 = scmp.lt.s32.totalorder %s182_s6, %s182_s6 }
  0x28   :  { %v47_v4 = vstv %s45_s1  ;;  %217 = vmatpush3.msra.mxu0 %v83_v3  ;;  %v76_v26 = vld [vmem:[#allocation4 + $0x18] sm:$0xff]  ;;  %v75_v27 = vld [vmem:[#allocation4 + $0x10] sm:$0xff]  ;;  %v73_v31 = vld [vmem:[#allocation4] sm:$0xff]  ;;  %s299_s7 = scalar_lea.vmem %s182_s6, 64 }
  0x29   :  { %v52_v5 = vstv %s191_s28  ;;  %218 = vmatprep.subr.mxu0 %v334_v0  ;;  %v48_v10 = vmul.f32 %v47_v4, %v46_v7  ;;  %v86_v33 = vld [vmem:[#allocation4 + $0x30] sm:$0xf]  ;;  %v87_v34 = vld [vmem:[#allocation4 + $0x34] sm:$0xf]  ;;  %v89_v35 = vld [vmem:[#allocation4 + $0x44] sm:$0xf]  ;;  %p300_p10 = scmp.ne.s32.totalorder %s182_s6, %s299_s7  ;;  %p305_p12 = scmp.lt.s32.totalorder %s299_s7, %s299_s7 }
  0x2a   :  { %v53_v11 = vmul.f32 %v52_v5, %v51_v8  ;;  %219 = vmatpush3.msra.mxu0 %v82_v6  ;;  %v58_v13 = vstv %s192_s29  ;;  %v90_v36 = vld [vmem:[#allocation4 + $0x48] sm:$0xf]  ;;  %v88_v37 = vmax.f32 %v86_v33, %v87_v34 }
  0x2b   :  { %220 = vmatprep.subr.mxu0 %v334_v0  ;;  %v59_v17 = vmul.f32 %v58_v13, %v57_v12  ;;  %v64_v19 = vstv %s193_s2  ;;  %v91_v38 = vmax.f32 %v89_v35, %v90_v36  ;;  %p306_p13 = por %p305_p12, %p304_p11 }
  0x2c   :  { %221 = vmatpush3.msra.mxu0 %v81_v9  ;;  %v54_v16 = vadd.f32 %v53_v11, %v48_v10  ;;  %v65_v23 = vmul.f32 %v64_v19, %v63_v18  ;;  %v70_v25 = vstv %s194_s30 }
  0x2d   :  { %222 = vmatprep.subr.mxu0 %v334_v0  ;;  %v71_v29 = vmul.f32 %v70_v25, %v69_v24  ;;  %v92_v39 = vmax.f32 %v88_v37, %v91_v38  ;;  %v94_v40 = vstv %s195_s4  ;;  %p307_p0 = pnand %p306_p13, %p300_p10 }
  0x2e   :  { %223 = vmatpush3.msra.mxu0 %v80_v14  ;;  %v60_v22 = vadd.f32 %v59_v17, %v54_v16 }
  0x2f   :  { %224 = vmatprep.subr.mxu0 %v334_v0  ;;  %v95_v41 = vmul.f32 %v94_v40, %v92_v39 }
  0x30   :  { %225 = vmatpush3.msra.mxu0 %v79_v15  ;;  %v66_v28 = vadd.f32 %v65_v23, %v60_v22 }
  0x31   :  { %226 = vmatprep.subr.mxu0 %v334_v0 }
  0x32   :  { %227 = vmatpush3.msra.mxu0 %v78_v20  ;;  %v72_v32 = vadd.f32 %v71_v29, %v66_v28 }
  0x33   :  { %228 = vmatprep.subr.mxu0 %v334_v0 }
  0x34   :  { %229 = vmatpush3.msra.mxu0 %v77_v21 }
  0x35   :  { %230 = vmatprep.subr.mxu0 %v334_v0 }
  0x36   :  { %231 = vmatpush3.msra.mxu0 %v76_v26 }
  0x37   :  { %232 = vmatprep.subr.mxu0 %v334_v0 }
  0x38   :  { %233 = vmatpush3.msra.mxu0 %v75_v27 }
  0x39   :  { %234 = vmatprep.subr.mxu0 %v334_v0 }
  0x3a   :  { %235 = vmatpush3.msra.mxu0 %v74_v30 }
  0x3b   :  { %236 = vmatprep.subr.mxu0 %v334_v0 }
  0x3c   :  { %237 = vmatpush3.msra.mxu0 %v73_v31 }
  0x3d   :  { %239 = vmatmul.mubr.msk.f32.vlgmr.msra.gmra.mxu0 %vm96_vm2, %v72_v32 }
  0xfd   :  { %v170_v42 = vpop.f32.mrf.mxu0 }
  0xfe   :  { %v171_v43 = vadd.f32 %v170_v42, %v95_v41 }
  0xff   :  { %v240_v44 = vpop.f32.mrf.mxu0 }
 0x100   :  { %174 = vst [vmem:[#allocation9] sm:$0xf] %v171_v43 }
 0x101   :  { %310 = shalt.err (!%p307_p0)
}
 0x102   :  { %184 = dma.vmem_to_hbm [thread:$0]  %s182_s6, 64, %s386_s3, [#allocation6]  }
 0x103   :  { %325 = dma.done.wait [#allocation6], 64  }
 0x104   :  { %326 = vsyncadd [#allocation6], 4294967232 }
 0x105   :  { %188 = vsyncpa [#allocation5], 1 }
 0x106   :  { %189 = vsyncpa [#allocation8], 1 }
 0x107   :  { %190 = vsyncpa [#allocation6], 1 }

</bundles_post_ra>
